<compile_context>
chip_gen: v6e
topology: v6e:2x2x1
jax: 0.10.0
libtpu: 0.0.40
codegen_flags: <defaults>
</compile_context>

<pallas_src>
import jax
import jax.numpy as jnp
from jax import lax
from jax.experimental import pallas as pl
from jax.experimental.pallas import tpu as pltpu

HID1, HID2 = 64, 32

MIN_TB = 512        # below this, per-grid-step overhead dominates
MAX_TB = 8192       # VMEM at this tile: x 4 MiB + out 0.25 MiB (double-buffered)
                    # + h1/h2 spill ~3 MiB  << 32 MiB scoped default (v5e/v6e/v7x)
TARGET_STEPS = 4    # keep >=2 (ideally 4-8) grid steps so v7x megacore has work


def _pick_batch_tile(B):
    """Pick the lane tile over the batch.

    B <= MIN_TB: one full-extent block (grid of 1).
    Otherwise ~B/TARGET_STEPS, rounded up to a 128-lane multiple, clamped to
    [MIN_TB, MAX_TB]."""
    if B <= MIN_TB:
        return B
    tb = pl.cdiv(B, TARGET_STEPS)
    tb = ((tb + 127) // 128) * 128
    return max(MIN_TB, min(tb, MAX_TB))


def _resident_spec(shape):
    """BlockSpec for an operand fetched once and kept VMEM-resident."""
    ndim = len(shape)
    index_map = lambda i: (0,) * ndim
    if hasattr(pl, "Buffered"):
        try:
            # Constant index map -> never revisited -> one pipeline buffer suffices.
            return pl.BlockSpec(shape, index_map, pipeline_mode=pl.Buffered(1))
        except Exception:  # older BlockSpec signature / unsupported buffer count
            pass
    return pl.BlockSpec(shape, index_map)


def qnet_kernel(x_ref, w1_ref, b1_ref, w2_ref, b2_ref, w3_ref, b3_ref, out_ref):
    # x_ref: (TB, dim_state) — native batch-major tile, one contiguous DMA.
    x = x_ref[...]

    # fc1 + ReLU: contract over dim_state (last dim of BOTH operands), so the
    # input transpose is absorbed into the MXU feed of a K=4 operand.
    # (HID1, dim_state) x (TB, dim_state) -> (HID1, TB); batch lands on lanes.
    h1 = lax.dot_general(
        w1_ref[...], x,
        dimension_numbers=(((1,), (1,)), ((), ())),
        preferred_element_type=jnp.float32,
    ) + b1_ref[...]
    h1 = jnp.maximum(h1, 0.0)

    # fc2 + ReLU: (HID2, HID1) @ (HID1, TB) -> (HID2, TB)
    h2 = jnp.dot(w2_ref[...], h1, preferred_element_type=jnp.float32) + b2_ref[...]
    h2 = jnp.maximum(h2, 0.0)

    # fc3: (num_action, HID2) @ (HID2, TB) -> (num_action, TB)
    h3 = jnp.dot(w3_ref[...], h2, preferred_element_type=jnp.float32) + b3_ref[...]
    out_ref[...] = h3.astype(out_ref.dtype)


def _qnet_call(state, w1, b1, w2, b2, w3, b3):
    """state: (B, dim_state) f32.  Weights (out, in), biases (out, 1).
    Returns Q-values in CN layout (num_action, B) — batch on the lane axis."""
    B, dim_state = state.shape
    num_action = w3.shape[0]

    tb = _pick_batch_tile(B)
    grid = (pl.cdiv(B, tb),)

    flops = 2 * B * (dim_state * HID1 + HID1 * HID2 + HID2 * num_action)
    bytes_accessed = 4 * (
        B * (dim_state + num_action)
        + w1.size + b1.size + w2.size + b2.size + w3.size + b3.size
    )

    return pl.pallas_call(
        qnet_kernel,
        out_shape=jax.ShapeDtypeStruct((num_action, B), jnp.float32),
        grid=grid,
        in_specs=[
            # x walks batch tiles in its native (B, dim_state) layout.
            pl.BlockSpec((tb, dim_state), lambda i: (i, 0)),
            _resident_spec(w1.shape), _resident_spec(b1.shape),
            _resident_spec(w2.shape), _resident_spec(b2.shape),
            _resident_spec(w3.shape), _resident_spec(b3.shape),
        ],
        out_specs=pl.BlockSpec((num_action, tb), lambda i: (0, i)),
        compiler_params=pltpu.CompilerParams(
            dimension_semantics=("parallel",),   # megacore split on v7x; no-op v5e/v6e
            # vmem_limit_bytes: not needed — tiles stay far below the 32 MiB scoped
            # default even at MAX_TB (relevant only if tb is pushed past ~32k).
        ),
        cost_estimate=pl.CostEstimate(
            flops=flops, transcendentals=0, bytes_accessed=bytes_accessed),
    )(state, w1, b1, w2, b2, w3, b3)


@jax.jit
def qnet_forward_cn(state, params):
    """state: (B, dim_state) -> Q-values in (num_action, B) layout.

    Preferred entry point for consumers that can stay in CN layout (e.g. greedy
    action = jnp.argmax(q, axis=0)); avoids any boundary transpose."""
    return _qnet_call(
        state,
        params["w1"], params["b1"][:, None],
        params["w2"], params["b2"][:, None],
        params["w3"], params["b3"][:, None],
    )


@jax.jit
def qnet_forward(state, params):
    """Matches QNet.forward: state (B, dim_state) -> (B, num_action).

    Only the tiny (num_action, B) output is transposed at the boundary; the
    input transpose is fused into the kernel."""
    return qnet_forward_cn(state, params).T


def init_params(key, dim_state, num_action):
    """nn.Linear-style init: weight (out, in), bias (out,), U(+/- 1/sqrt(fan_in))."""
    dims = [(dim_state, HID1), (HID1, HID2), (HID2, num_action)]
    params = {}
    for i, (fan_in, fan_out) in enumerate(dims, start=1):
        key, kw, kb = jax.random.split(key, 3)
        bound = 1.0 / jnp.sqrt(float(fan_in))
        params[f"w{i}"] = jax.random.uniform(
            kw, (fan_out, fan_in), jnp.float32, minval=-bound, maxval=bound)
        params[f"b{i}"] = jax.random.uniform(
            kb, (fan_out,), jnp.float32, minval=-bound, maxval=bound)
    return params


def qnet_reference(state, params):
    h1 = jnp.maximum(state @ params["w1"].T + params["b1"], 0.0)
    h2 = jnp.maximum(h1 @ params["w2"].T + params["b2"], 0.0)
    return h2 @ params["w3"].T + params["b3"]


if __name__ == "__main__":
    dim_state, num_action = 4, 2

    key = jax.random.PRNGKey(0)
    key, k_params = jax.random.split(key)
    params = init_params(k_params, dim_state, num_action)

    # Small RL-style batch (single full-extent tile), matching the module's use.
    key, ks = jax.random.split(key)
    state_small = jax.random.normal(ks, (8, dim_state), jnp.float32)
    out_small = jax.block_until_ready(qnet_forward(state_small, params))
    ref_small = qnet_reference(state_small, params)
    assert out_small.shape == (8, num_action)
    assert jnp.allclose(out_small, ref_small, atol=1e-5, rtol=1e-5)

    # Larger batch: tb=1024, 4 pipelined grid steps, megacore-eligible on v7x.
    key, kl = jax.random.split(key)
    state_big = jax.random.normal(kl, (4096, dim_state), jnp.float32)
    out_big = jax.block_until_ready(qnet_forward(state_big, params))
    ref_big = qnet_reference(state_big, params)
    assert out_big.shape == (4096, num_action)
    assert jnp.allclose(out_big, ref_big, atol=1e-5, rtol=1e-5)

    # Ragged final tile (B not a multiple of tb): padded columns compute on
    # unspecified data but are clipped on writeback — benign because batch
    # columns are independent (no cross-batch reduction in this kernel).
    key, kr = jax.random.split(key)
    state_rag = jax.random.normal(kr, (3000, dim_state), jnp.float32)
    out_rag = jax.block_until_ready(qnet_forward(state_rag, params))
    ref_rag = qnet_reference(state_rag, params)
    assert out_rag.shape == (3000, num_action)
    assert jnp.allclose(out_rag, ref_rag, atol=1e-5, rtol=1e-5)

    # CN entry point (no boundary transpose at all) for argmax-style consumers.
    out_cn = jax.block_until_ready(qnet_forward_cn(state_small, params))
    assert out_cn.shape == (num_action, 8)
    assert jnp.allclose(out_cn.T, ref_small, atol=1e-5, rtol=1e-5)

    print("KERNEL_OK")
</pallas_src>

<mosaic_0001>
module attributes {stable_mosaic.version = 11 : i64} {
  func.func @qnet_kernel(%arg0: i32, %arg1: memref<8x4xf32, #tpu.memory_space<vmem>>, %arg2: memref<64x4xf32, #tpu.memory_space<vmem>>, %arg3: memref<64x1xf32, #tpu.memory_space<vmem>>, %arg4: memref<32x64xf32, #tpu.memory_space<vmem>>, %arg5: memref<32x1xf32, #tpu.memory_space<vmem>>, %arg6: memref<2x32xf32, #tpu.memory_space<vmem>>, %arg7: memref<2x1xf32, #tpu.memory_space<vmem>>, %arg8: memref<2x8xf32, #tpu.memory_space<vmem>>) attributes {dimension_semantics = [#tpu.dimension_semantics<parallel>], iteration_bounds = array<i64: 1>, scalar_prefetch = 0 : i64, scratch_operands = 0 : i64, tpu.core_type = #tpu.core_type<tc>, window_params = [{transform_indices = @transform_0, window_bounds = array<i64: 8, 4>}, {pipeline_mode = #tpu.pipeline_mode<synchronous>, transform_indices = @transform_1, window_bounds = array<i64: 64, 4>}, {pipeline_mode = #tpu.pipeline_mode<synchronous>, transform_indices = @transform_2, window_bounds = array<i64: 64, 1>}, {pipeline_mode = #tpu.pipeline_mode<synchronous>, transform_indices = @transform_3, window_bounds = array<i64: 32, 64>}, {pipeline_mode = #tpu.pipeline_mode<synchronous>, transform_indices = @transform_4, window_bounds = array<i64: 32, 1>}, {pipeline_mode = #tpu.pipeline_mode<synchronous>, transform_indices = @transform_5, window_bounds = array<i64: 2, 32>}, {pipeline_mode = #tpu.pipeline_mode<synchronous>, transform_indices = @transform_6, window_bounds = array<i64: 2, 1>}, {transform_indices = @transform_7, window_bounds = array<i64: 2, 8>}]} {
    %c0 = arith.constant 0 : index
    %c0_0 = arith.constant 0 : index
    %0 = vector.load %arg1[%c0, %c0_0] : memref<8x4xf32, #tpu.memory_space<vmem>>, vector<8x4xf32>
    %c0_1 = arith.constant 0 : index
    %c0_2 = arith.constant 0 : index
    %1 = vector.load %arg2[%c0_1, %c0_2] : memref<64x4xf32, #tpu.memory_space<vmem>>, vector<64x4xf32>
    %cst = arith.constant dense<0.000000e+00> : vector<64x8xf32>
    %2 = tpu.matmul %1, %0, %cst {dimension_numbers = #tpu.dot_dimension_numbers<[1], [1], [0], [0], [0, 0, 1, 0], [], []>} : vector<64x4xf32>, vector<8x4xf32>, vector<64x8xf32> -> vector<64x8xf32>
    %c0_3 = arith.constant 0 : index
    %c0_4 = arith.constant 0 : index
    %3 = vector.load %arg3[%c0_3, %c0_4] : memref<64x1xf32, #tpu.memory_space<vmem>>, vector<64x1xf32>
    %4 = vector.broadcast %3 : vector<64x1xf32> to vector<64x8xf32>
    %5 = arith.addf %2, %4 : vector<64x8xf32>
    %cst_5 = arith.constant 0.000000e+00 : f32
    %6 = vector.broadcast %cst_5 : f32 to vector<64x8xf32>
    %7 = arith.maximumf %5, %6 : vector<64x8xf32>
    %c0_6 = arith.constant 0 : index
    %c0_7 = arith.constant 0 : index
    %8 = vector.load %arg4[%c0_6, %c0_7] : memref<32x64xf32, #tpu.memory_space<vmem>>, vector<32x64xf32>
    %cst_8 = arith.constant dense<0.000000e+00> : vector<32x8xf32>
    %9 = tpu.matmul %8, %7, %cst_8 {dimension_numbers = #tpu.dot_dimension_numbers<[1], [0], [0], [1], [0, 0, 1, 1], [], []>} : vector<32x64xf32>, vector<64x8xf32>, vector<32x8xf32> -> vector<32x8xf32>
    %c0_9 = arith.constant 0 : index
    %c0_10 = arith.constant 0 : index
    %10 = vector.load %arg5[%c0_9, %c0_10] : memref<32x1xf32, #tpu.memory_space<vmem>>, vector<32x1xf32>
    %11 = vector.broadcast %10 : vector<32x1xf32> to vector<32x8xf32>
    %12 = arith.addf %9, %11 : vector<32x8xf32>
    %cst_11 = arith.constant 0.000000e+00 : f32
    %13 = vector.broadcast %cst_11 : f32 to vector<32x8xf32>
    %14 = arith.maximumf %12, %13 : vector<32x8xf32>
    %c0_12 = arith.constant 0 : index
    %c0_13 = arith.constant 0 : index
    %15 = vector.load %arg6[%c0_12, %c0_13] : memref<2x32xf32, #tpu.memory_space<vmem>>, vector<2x32xf32>
    %cst_14 = arith.constant dense<0.000000e+00> : vector<2x8xf32>
    %16 = tpu.matmul %15, %14, %cst_14 {dimension_numbers = #tpu.dot_dimension_numbers<[1], [0], [0], [1], [0, 0, 1, 1], [], []>} : vector<2x32xf32>, vector<32x8xf32>, vector<2x8xf32> -> vector<2x8xf32>
    %c0_15 = arith.constant 0 : index
    %c0_16 = arith.constant 0 : index
    %17 = vector.load %arg7[%c0_15, %c0_16] : memref<2x1xf32, #tpu.memory_space<vmem>>, vector<2x1xf32>
    %18 = vector.broadcast %17 : vector<2x1xf32> to vector<2x8xf32>
    %19 = arith.addf %16, %18 : vector<2x8xf32>
    %c0_17 = arith.constant 0 : index
    %c0_18 = arith.constant 0 : index
    %20 = vector.load %arg8[%c0_17, %c0_18] : memref<2x8xf32, #tpu.memory_space<vmem>>, vector<2x8xf32>
    tpu.vector_store %arg8[%c0_17, %c0_18], %19 {strides = array<i32>} : memref<2x8xf32, #tpu.memory_space<vmem>>, vector<2x8xf32>,
    return
  }
  func.func @transform_0(%arg0: i32) -> (i32, i32) {
    %c0_i32 = arith.constant 0 : i32
    %c0_i32_0 = arith.constant 0 : i32
    return %arg0, %c0_i32 : i32, i32
  }
  func.func @transform_1(%arg0: i32) -> (i32, i32) {
    %c0_i32 = arith.constant 0 : i32
    %c0_i32_0 = arith.constant 0 : i32
    %c0_i32_1 = arith.constant 0 : i32
    return %c0_i32, %c0_i32_0 : i32, i32
  }
  func.func @transform_2(%arg0: i32) -> (i32, i32) {
    %c0_i32 = arith.constant 0 : i32
    %c0_i32_0 = arith.constant 0 : i32
    %c0_i32_1 = arith.constant 0 : i32
    return %c0_i32, %c0_i32_0 : i32, i32
  }
  func.func @transform_3(%arg0: i32) -> (i32, i32) {
    %c0_i32 = arith.constant 0 : i32
    %c0_i32_0 = arith.constant 0 : i32
    %c0_i32_1 = arith.constant 0 : i32
    return %c0_i32, %c0_i32_0 : i32, i32
  }
  func.func @transform_4(%arg0: i32) -> (i32, i32) {
    %c0_i32 = arith.constant 0 : i32
    %c0_i32_0 = arith.constant 0 : i32
    %c0_i32_1 = arith.constant 0 : i32
    return %c0_i32, %c0_i32_0 : i32, i32
  }
  func.func @transform_5(%arg0: i32) -> (i32, i32) {
    %c0_i32 = arith.constant 0 : i32
    %c0_i32_0 = arith.constant 0 : i32
    %c0_i32_1 = arith.constant 0 : i32
    return %c0_i32, %c0_i32_0 : i32, i32
  }
  func.func @transform_6(%arg0: i32) -> (i32, i32) {
    %c0_i32 = arith.constant 0 : i32
    %c0_i32_0 = arith.constant 0 : i32
    %c0_i32_1 = arith.constant 0 : i32
    return %c0_i32, %c0_i32_0 : i32, i32
  }
  func.func @transform_7(%arg0: i32) -> (i32, i32) {
    %c0_i32 = arith.constant 0 : i32
    %c0_i32_0 = arith.constant 0 : i32
    return %c0_i32, %arg0 : i32, i32
  }
}

</mosaic_0001>

<bundles_post_ra>
// kernel: qnet_forward_cn.1
= control target key start
LH: loop header
LB: loop body
LE: loop exit
PB: predicated region body
PF: predicated region fallthrough
CT: control target
= control target key end

     0   :  { %vm84_vm0 = vcmask 31744   ;;  %v567_v3 = vmov 0   ;;  %s709_s0 = inlined_call_operand.vmem [shape: f32[8,4], index: 0, kind: input, shape index: {}]   ;;  %s710_s1 = inlined_call_operand.vmem [shape: f32[64,4], index: 1, kind: input, shape index: {}]   ;;  %s711_s2 = inlined_call_operand.vmem [shape: f32[64,1], index: 2, kind: input, shape index: {}]   ;;  %s712_s3 = inlined_call_operand.vmem [shape: f32[32,64], index: 3, kind: input, shape index: {}]   ;;  %s713_s4 = inlined_call_operand.vmem [shape: f32[32,1], index: 4, kind: input, shape index: {}]   ;;  %s714_s5 = inlined_call_operand.vmem [shape: f32[2,32], index: 5, kind: input, shape index: {}]   ;;  %s715_s6 = inlined_call_operand.vmem [shape: f32[2,1], index: 6, kind: input, shape index: {}]   ;;  %s716_s7 = inlined_call_operand.hbm [shape: f32[2,8], index: 7, kind: output, shape index: {}]  }
   0x1   :  { %v27_v0 = vld [vmem:[%s709_s0] sm:$0xff]  ;;  %v29_v2 = vld [vmem:[%s710_s1 + $0x8] sm:$0xff]  ;;  %543 = vset.pattern.permute.xlu0 %v567_v3  ;;  %v30_v4 = vld [vmem:[%s710_s1 + $0x10] sm:$0xff]  ;;  %544 = vset.pattern.permute.xlu1 %v567_v3 }
   0x2   :  { %v28_v1 = vld [vmem:[%s710_s1] sm:$0xff]  ;;  %492 = vmatprep.subr.msk.mxu0 %vm84_vm0, %v27_v0  ;;  %v43_v5 = vld [vmem:[%s711_s2 + $0x38] sm:$0xff]  ;;  %v41_v6 = vld [vmem:[%s711_s2 + $0x28] sm:$0xff] }
   0x3   :  { %494 = vmatprep.mubr.msk.f32.mxu0 %vm84_vm0, %v28_v1  ;;  %493 = vmatpush3.xpose.msk.msra.mxu0 %vm84_vm0, %v27_v0  ;;  %v42_v7 = vld [vmem:[%s711_s2 + $0x30] sm:$0xff]  ;;  %v40_v8 = vld [vmem:[%s711_s2 + $0x20] sm:$0xff]  ;;  %v31_v9 = vld [vmem:[%s710_s1 + $0x18] sm:$0xff] }
   0x4   :  { %81 = vperm.xlu0 %543, %v43_v5   ;;  %71 = vperm.xlu1 %544, %v41_v6   ;;  %v32_v10 = vld [vmem:[%s710_s1 + $0x20] sm:$0xff] }
   0x6   :  { %495 = vmatmul.mubr.msk.f32.vlgmr.msra.gmra.mxu0 %vm84_vm0, %v29_v2 }
   0x7   :  { %497 = vmatprep.mubr.msk.f32.mxu0 %vm84_vm0, %v30_v4 }
   0x8   :  { %12 = vsyncpa [#allocation3], 0  ;;  %76 = vperm.xlu0 %543, %v42_v7   ;;  %66 = vperm.xlu1 %544, %v40_v8   ;;  %v39_v11 = vld [vmem:[%s711_s2 + $0x18] sm:$0xff]  ;;  %v38_v12 = vld [vmem:[%s711_s2 + $0x10] sm:$0xff]  ;;  %vm253_vm1 = vcmask 523264   ;;  %v568_v59 = vmov 0.0  }
   0x9   :  { %v33_v13 = vld [vmem:[%s710_s1 + $0x28] sm:$0xff]  ;;  %v34_v14 = vld [vmem:[%s710_s1 + $0x30] sm:$0xff]  ;;  %v36_v16 = vld [vmem:[%s711_s2] sm:$0xff]  ;;  %528 = vmatprep.subr.mxu0 %v568_v59  ;;  %vm569_vm2 = vmmov 0   ;;  %vm362_vm3 = vcmask 261120   ;;  %s570_s25 = smov [#allocation2]  }
   0xa   :  { %498 = vmatmul.mubr.msk.f32.gmra.mxu0 %vm84_vm0, %v31_v9  ;;  %v37_v15 = vld [vmem:[%s711_s2 + $0x8] sm:$0xff]  ;;  %v35_v17 = vld [vmem:[%s710_s1 + $0x38] sm:$0xff]  ;;  %v231_v19 = vld [vmem:[%s713_s4 + $0x10] sm:$0xff]  ;;  %s444_s26 = sshll.u32 %s570_s25, 4  ;;  %vm436_vm4 = vcmask 58368   ;;  %s445_s26 = int_to_ptr.vmem [resolvable:$true] %s444_s26 }
   0xb   :  { %500 = vmatprep.mubr.msk.f32.mxu0 %vm84_vm0, %v32_v10  ;;  %v232_v18 = vld [vmem:[%s713_s4 + $0x18] sm:$0xff]  ;;  %v230_v20 = vld [vmem:[%s713_s4 + $0x8] sm:$0xff]  ;;  %v229_v21 = vld [vmem:[%s713_s4] sm:$0xff]  ;;  %s545_s27 = scalar_lea.vmem %s445_s26, 32  ;;  %p550_p1 = scmp.lt.s32.totalorder %s445_s26, %s445_s26 }
   0xc   :  { %61 = vperm.xlu0 %543, %v39_v11   ;;  %56 = vperm.xlu1 %544, %v38_v12   ;;  %v356_v22 = vld [vmem:[%s715_s6] sm:$0x3]  ;;  %v226_v56 = vld [vmem:[%s712_s3 + $0x8] sm:$0xff]  ;;  %v227_v57 = vld [vmem:[%s712_s3 + $0x10] sm:$0xff]  ;;  %p546_p0 = scmp.ne.s32.totalorder %s445_s26, %s545_s27  ;;  %p551_p2 = scmp.lt.s32.totalorder %s545_s27, %s545_s27 }
   0xd   :  { %v225_v23 = vld [vmem:[%s712_s3] sm:$0xff]  ;;  %v228_v58 = vld [vmem:[%s712_s3 + $0x18] sm:$0xff] }
   0xe   :  { %501 = vmatmul.mubr.msk.f32.gmra.mxu0 %vm84_vm0, %v33_v13  ;;  %522 = vmatprep.mubr.msk.f32.mxu1 %vm253_vm1, %v225_v23  ;;  %v355_v12 = vld [vmem:[%s714_s5] sm:$0x3]  ;;  %p552_p3 = por %p551_p2, %p550_p1 }
   0xf   :  { %503 = vmatprep.mubr.msk.f32.mxu0 %vm84_vm0, %v34_v14 }
  0x10   :  { %51 = vperm.xlu0 %543, %v37_v15   ;;  %46 = vperm.xlu1 %544, %v36_v16   ;;  %p553_p4 = pnand %p552_p3, %p546_p0 }
  0x12   :  { %504 = vmatmul.mubr.msk.f32.gmra.mxu0 %vm84_vm0, %v35_v17 }
  0x13   :  { %536 = vmatprep.mubr.msk.f32.mxu0 %vm569_vm2, %v568_v59 }
  0x14   :  { %250 = vperm.xlu0 %543, %v232_v18   ;;  %245 = vperm.xlu1 %544, %v231_v19  }
  0x18   :  { %240 = vperm.xlu0 %543, %v230_v20   ;;  %235 = vperm.xlu1 %544, %v229_v21  }
  0x1c   :  { %359 = vperm.xlu0 %543, %v356_v22  }
  0x7f   :  { %v82_v26 = vpop.permute.xlu0 %81  ;;  %v72_v27 = vpop.permute.xlu1 %71 }
  0x83   :  { %v77_v31 = vpop.permute.xlu0 %76  ;;  %v67_v32 = vpop.permute.xlu1 %66 }
  0x87   :  { %v62_v40 = vpop.permute.xlu0 %61  ;;  %v57_v41 = vpop.permute.xlu1 %56 }
  0x8b   :  { %v52_v48 = vpop.permute.xlu0 %51  ;;  %v47_v49 = vpop.permute.xlu1 %46 }
  0x8f   :  { %v251_v60 = vpop.permute.xlu0 %250  ;;  %v246_v62 = vpop.permute.xlu1 %245 }
  0x93   :  { %v241_v2 = vpop.permute.xlu0 %240  ;;  %v236_v7 = vpop.permute.xlu1 %235 }
  0x97   :  { %v360_v13 = vpop.permute.xlu0 %359 }
  0xc6   :  { %v496_v24 = vpop.f32.mrf.mxu0 }
  0xc7   :  { %v184_v50 = vadd.f32 %v496_v24, %v52_v48 }
  0xc8   :  { %v178_v25 = vpop.f32.mrf.mxu0 }
  0xc9   :  { %v179_v52 = vadd.f32 %v178_v25, %v47_v49  ;;  %v218_v54 = vmax.f32 %v184_v50, 0.0 }
  0xca   :  { %v499_v28 = vpop.f32.mrf.mxu0 }
  0xcb   :  { %v194_v44 = vadd.f32 %v499_v28, %v62_v40  ;;  %v217_v55 = vmax.f32 %v179_v52, 0.0 }
  0xcc   :  { %v188_v29 = vpop.f32.mrf.mxu0 }
  0xcd   :  { %v189_v46 = vadd.f32 %v188_v29, %v57_v41  ;;  %v220_v51 = vmax.f32 %v194_v44, 0.0 }
  0xce   :  { %v502_v30 = vpop.f32.mrf.mxu0 }
  0xcf   :  { %v204_v37 = vadd.f32 %v502_v30, %v72_v27  ;;  %v219_v53 = vmax.f32 %v189_v46, 0.0 }
  0xd0   :  { %v198_v33 = vpop.f32.mrf.mxu0 }
  0xd1   :  { %v199_v42 = vadd.f32 %v198_v33, %v67_v32  ;;  %v222_v45 = vmax.f32 %v204_v37, 0.0 }
  0xd2   :  { %v505_v34 = vpop.f32.mrf.mxu0 }
  0xd3   :  { %v214_v35 = vadd.f32 %v505_v34, %v82_v26  ;;  %v221_v47 = vmax.f32 %v199_v42, 0.0 }
  0xd4   :  { %v208_v36 = vpop.f32.mrf.mxu0 }
  0xd5   :  { %v224_v38 = vmax.f32 %v214_v35, 0.0  ;;  %v209_v39 = vadd.f32 %v208_v36, %v77_v31 }
  0xd7   :  { %v223_v43 = vmax.f32 %v209_v39, 0.0  ;;  %506 = vmatprep.subr.mxu1 %v224_v38 }
  0xd8   :  { %507 = vmatpush3.msra.mxu1 %v224_v38 }
  0xd9   :  { %508 = vmatprep.subr.mxu1 %v223_v43 }
  0xda   :  { %509 = vmatpush3.msra.mxu1 %v223_v43 }
  0xdb   :  { %510 = vmatprep.subr.mxu1 %v222_v45 }
  0xdc   :  { %511 = vmatpush3.msra.mxu1 %v222_v45 }
  0xdd   :  { %512 = vmatprep.subr.mxu1 %v221_v47 }
  0xde   :  { %513 = vmatpush3.msra.mxu1 %v221_v47 }
  0xdf   :  { %514 = vmatprep.subr.mxu1 %v220_v51 }
  0xe0   :  { %515 = vmatpush3.msra.mxu1 %v220_v51 }
  0xe1   :  { %516 = vmatprep.subr.mxu1 %v219_v53 }
  0xe2   :  { %517 = vmatpush3.msra.mxu1 %v219_v53 }
  0xe3   :  { %518 = vmatprep.subr.mxu1 %v218_v54 }
  0xe4   :  { %519 = vmatpush3.msra.mxu1 %v218_v54 }
  0xe5   :  { %520 = vmatprep.subr.mxu1 %v217_v55 }
  0xe6   :  { %521 = vmatpush3.msra.mxu1 %v217_v55 }
  0xe7   :  { %523 = vmatmul.mubr.msk.f32.vlgmr.msra.gmra.mxu1 %vm253_vm1, %v226_v56 }
  0xe8   :  { %525 = vmatprep.mubr.msk.f32.mxu1 %vm253_vm1, %v227_v57 }
  0xeb   :  { %526 = vmatmul.mubr.msk.f32.gmra.mxu1 %vm253_vm1, %v228_v58 }
 0x1a7   :  { %v524_v61 = vpop.f32.mrf.mxu1 }
 0x1a8   :  { %v338_v4 = vadd.f32 %v524_v61, %v241_v2 }
 0x1a9   :  { %v332_v63 = vpop.f32.mrf.mxu1 }
 0x1aa   :  { %v333_v8 = vadd.f32 %v332_v63, %v236_v7  ;;  %v352_v10 = vmax.f32 %v338_v4, 0.0 }
 0x1ab   :  { %v527_v0 = vpop.f32.mrf.mxu1 }
 0x1ac   :  { %v348_v1 = vadd.f32 %v527_v0, %v251_v60  ;;  %v351_v11 = vmax.f32 %v333_v8, 0.0 }
 0x1ad   :  { %v342_v3 = vpop.f32.mrf.mxu1 }
 0x1ae   :  { %v354_v5 = vmax.f32 %v348_v1, 0.0  ;;  %v343_v6 = vadd.f32 %v342_v3, %v246_v62 }
 0x1b0   :  { %v353_v9 = vmax.f32 %v343_v6, 0.0  ;;  %529 = vmatpush3.msra.mxu0 %v354_v5 }
 0x1b1   :  { %530 = vmatprep.subr.mxu0 %v568_v59 }
 0x1b2   :  { %531 = vmatpush3.msra.mxu0 %v353_v9 }
 0x1b3   :  { %532 = vmatprep.subr.mxu0 %v568_v59 }
 0x1b4   :  { %533 = vmatpush3.msra.mxu0 %v352_v10 }
 0x1b5   :  { %534 = vmatprep.subr.mxu0 %v568_v59 }
 0x1b6   :  { %535 = vmatpush3.msra.mxu0 %v351_v11 }
 0x1b7   :  { %537 = vmatmul.mubr.msk.f32.vlgmr.msra.gmra.mxu0 %vm362_vm3, %v355_v12 }
 0x277   :  { %v432_v14 = vpop.f32.mrf.mxu0 }
 0x278   :  { %v433_v15 = vadd.f32 %v432_v14, %v360_v13 }
 0x279   :  { %v538_v16 = vpop.f32.mrf.mxu0 }
 0x27a   :  { %437 = vst.msk [vmem:[#allocation2] sm:$0x3] %vm436_vm4, %v433_v15 }
 0x27b   :  { %556 = shalt.err (!%p553_p4)
}
 0x27c   :  { %447 = dma.vmem_to_hbm [thread:$0]  %s445_s26, 32, %s716_s7, [#allocation3]  }
 0x27d   :  { %565 = dma.done.wait [#allocation3], 32  }
 0x27e   :  { %566 = vsyncadd [#allocation3], 4294967264 }
 0x27f   :  { %451 = vsyncpa [#allocation3], 1 }

</bundles_post_ra>
